<compile_context>
chip_gen: v5e
topology: v5e:2x2
jax: 0.10.0
libtpu: 0.0.40
codegen_flags: <defaults>
</compile_context>

<pallas_src>
import functools

import jax
import jax.numpy as jnp
from jax import lax
from jax.experimental import pallas as pl
from jax.experimental.pallas import tpu as pltpu


def _channelnorm_kernel(x_ref, w_ref, b_ref, o_ref, *, eps):
    # x_ref: (bb, C, T) block; reduce over the channel axis (axis 1, sublanes).
    x = x_ref[...].astype(jnp.float32)
    m = jnp.mean(x, axis=1, keepdims=True)            # (bb, 1, T) channel mean
    d = x - m
    v = jnp.mean(d * d, axis=1, keepdims=True)        # biased variance (matches torch)
    y = d * lax.rsqrt(v + eps)
    # w_ref / b_ref: (1, C, T) lane-replicated (or (1, C, 1) fallback) in f32.
    o_ref[...] = (w_ref[...] * y + b_ref[...]).astype(o_ref.dtype)


def channel_norm(x, weight, bias, eps=1e-6):
    """x: (B, C, H, W), matching the PyTorch module's NCHW forward."""
    B, C, H, W = x.shape
    HW = H * W
    itemsize = jnp.dtype(x.dtype).itemsize

    # --- per-generation VMEM capacity -> block budget ------------------------
    try:
        vmem_cap = int(pltpu.get_tpu_info().vmem_capacity_bytes)
    except Exception:
        vmem_cap = 64 * 1024 * 1024  # conservative fallback (v7x-sized)
    # ~8 MiB blocks on 128-MiB-VMEM chips (v5e/v6e), ~4 MiB on v7x (64 MiB).
    block_budget = max(2 * 1024 * 1024, vmem_cap // 16)

    # --- block sizing (sublane-padded accounting) ----------------------------
    sublanes = max(8, 32 // itemsize)                  # 8 f32, 16 bf16, 32 int8
    c_pad = pl.cdiv(C, sublanes) * sublanes
    n_cols = pl.cdiv(HW, 128)                          # 128-lane columns of flat spatial
    col_x = c_pad * 128 * itemsize                     # padded x bytes / batch row / column

    # Fill the budget: spatial columns first, then batch rows.
    cols = min(n_cols, max(1, block_budget // col_x))
    bb = min(B, max(1, block_budget // (cols * col_x)))

    # Keep the software pipeline busy: prefer >= 8 grid steps as long as blocks
    # stay >= ~256 KiB (measured roofline is reached for ~512 KiB-4 MiB tiles).
    MIN_BLOCK = 256 * 1024

    def n_steps(bb_, cols_):
        return pl.cdiv(B, bb_) * pl.cdiv(n_cols, cols_)

    while n_steps(bb, cols) < 8 and bb * cols * col_x > 2 * MIN_BLOCK:
        if bb > 1:
            bb = (bb + 1) // 2
        elif cols > 1:
            cols = (cols + 1) // 2
        else:
            break
    # Even for tiny problems, give v7x's two TensorCores one step each.
    while n_steps(bb, cols) < 2 and (bb > 1 or cols > 1):
        if bb > 1:
            bb = (bb + 1) // 2
        else:
            cols = (cols + 1) // 2

    t_hw = cols * 128
    n_b_steps = pl.cdiv(B, bb)
    n_hw_steps = pl.cdiv(HW, t_hw)

    # --- operands (no padding: ragged tail blocks are masked by Pallas) ------
    x2 = x.reshape(B, C, HW)
    # Lane-replicate weight/bias so the kernel never does a per-tile cross-lane
    # broadcast; constant index map -> fetched into VMEM once.  Fall back to
    # width-1 blocks if the replicated slabs would be big (very large C).
    wb_full = 2 * c_pad * t_hw * 4 <= block_budget
    wb_width = t_hw if wb_full else 1
    w3 = jnp.broadcast_to(weight.astype(jnp.float32).reshape(1, C, 1), (1, C, wb_width))
    b3 = jnp.broadcast_to(bias.astype(jnp.float32).reshape(1, C, 1), (1, C, wb_width))

    # --- grid: put the axis with more steps first (v7x dual-TC sharding) -----
    if n_hw_steps >= n_b_steps:
        grid = (n_hw_steps, n_b_steps)
        data_map = lambda s, b: (b, 0, s)
    else:
        grid = (n_b_steps, n_hw_steps)
        data_map = lambda b, s: (b, 0, s)
    const_map = lambda i, j: (0, 0, 0)

    # --- VMEM limit: actual double-buffer estimate + headroom, never the full
    #     physical capacity (critical on v7x's 64 MiB) -------------------------
    x_blk_bytes = bb * c_pad * t_hw * itemsize
    wb_blk_bytes = 2 * c_pad * max(wb_width, 128) * 4
    buf_bytes = 2 * (2 * x_blk_bytes + wb_blk_bytes)   # in + out + w + b, double-buffered
    vmem_limit = max(buf_bytes + 8 * 1024 * 1024, 32 * 1024 * 1024)
    vmem_limit = int(min(vmem_limit, max(vmem_cap - 16 * 1024 * 1024, vmem_cap // 2)))

    kernel = functools.partial(_channelnorm_kernel, eps=eps)

    # TODO(synk): if DMA is still exposed for very small-C shapes, sweep
    # pipeline_mode=pl.Buffered(3) on the x BlockSpec (needs VMEM headroom on v7x).
    out = pl.pallas_call(
        kernel,
        out_shape=jax.ShapeDtypeStruct((B, C, HW), x.dtype),
        grid_spec=pltpu.PrefetchScalarGridSpec(
            num_scalar_prefetch=0,
            grid=grid,
            in_specs=[
                pl.BlockSpec((bb, C, t_hw), data_map),
                pl.BlockSpec((1, C, wb_width), const_map),
                pl.BlockSpec((1, C, wb_width), const_map),
            ],
            out_specs=pl.BlockSpec((bb, C, t_hw), data_map),
        ),
        compiler_params=pltpu.CompilerParams(
            # No cross-tile reduction -> both axes parallel (v7x dual-TC shard).
            dimension_semantics=("parallel", "parallel"),
            vmem_limit_bytes=vmem_limit,
        ),
    )(x2, w3, b3)

    return out.reshape(B, C, H, W)


def channel_norm_ref(x, weight, bias, eps=1e-6):
    # Pure-JAX reference mirroring the PyTorch forward.
    m = jnp.mean(x, axis=1, keepdims=True)
    s = jnp.mean((x - m) ** 2, axis=1, keepdims=True)
    y = (x - m) * lax.rsqrt(s + eps)
    return weight[None, :, None, None] * y + bias[None, :, None, None]


if __name__ == "__main__":
    B, C, H, W = 2, 4, 16, 16
    key = jax.random.PRNGKey(0)
    kx, kw, kb = jax.random.split(key, 3)
    x = jax.random.normal(kx, (B, C, H, W), dtype=jnp.float32)
    # Module init is ones/zeros; perturb deterministically so the affine is exercised.
    weight = jnp.ones((C,), jnp.float32) + 0.1 * jax.random.normal(kw, (C,), jnp.float32)
    bias = jnp.zeros((C,), jnp.float32) + 0.1 * jax.random.normal(kb, (C,), jnp.float32)

    out = channel_norm(x, weight, bias)
    out = jax.block_until_ready(out)

    ref = channel_norm_ref(x, weight, bias)
    assert out.shape == (B, C, H, W)
    assert jnp.allclose(out, ref, atol=1e-5, rtol=1e-5)
    print("KERNEL_OK")
</pallas_src>

<mosaic_0001>
module attributes {stable_mosaic.version = 11 : i64} {
  func.func @_channelnorm_kernel(%arg0: i32, %arg1: i32, %arg2: memref<1x4x256xf32, #tpu.memory_space<vmem>>, %arg3: memref<1x4x256xf32, #tpu.memory_space<vmem>>, %arg4: memref<1x4x256xf32, #tpu.memory_space<vmem>>, %arg5: memref<1x4x256xf32, #tpu.memory_space<vmem>>) attributes {dimension_semantics = [#tpu.dimension_semantics<parallel>, #tpu.dimension_semantics<parallel>], iteration_bounds = array<i64: 2, 1>, scalar_prefetch = 0 : i64, scratch_operands = 0 : i64, tpu.core_type = #tpu.core_type<tc>, window_params = [{transform_indices = @transform_0, window_bounds = array<i64: 1, 4, 256>}, {pipeline_mode = #tpu.pipeline_mode<synchronous>, transform_indices = @transform_1, window_bounds = array<i64: 1, 4, 256>}, {pipeline_mode = #tpu.pipeline_mode<synchronous>, transform_indices = @transform_2, window_bounds = array<i64: 1, 4, 256>}, {transform_indices = @transform_3, window_bounds = array<i64: 1, 4, 256>}]} {
    %c0 = arith.constant 0 : index
    %c0_0 = arith.constant 0 : index
    %c0_1 = arith.constant 0 : index
    %0 = vector.load %arg2[%c0, %c0_0, %c0_1] : memref<1x4x256xf32, #tpu.memory_space<vmem>>, vector<1x4x256xf32>
    %cst = arith.constant dense<0.000000e+00> : vector<1x256xf32>
    %1 = vector.multi_reduction <add>, %0, %cst [1] : vector<1x4x256xf32> to vector<1x256xf32>
    %2 = vector.shape_cast %1 : vector<1x256xf32> to vector<1x1x256xf32>
    %cst_2 = arith.constant 4.000000e+00 : f32
    %3 = vector.broadcast %cst_2 : f32 to vector<1x1x256xf32>
    %4 = arith.divf %2, %3 : vector<1x1x256xf32>
    %5 = vector.broadcast %4 : vector<1x1x256xf32> to vector<1x4x256xf32>
    %6 = arith.subf %0, %5 : vector<1x4x256xf32>
    %7 = arith.mulf %6, %6 : vector<1x4x256xf32>
    %cst_3 = arith.constant dense<0.000000e+00> : vector<1x256xf32>
    %8 = vector.multi_reduction <add>, %7, %cst_3 [1] : vector<1x4x256xf32> to vector<1x256xf32>
    %9 = vector.shape_cast %8 : vector<1x256xf32> to vector<1x1x256xf32>
    %cst_4 = arith.constant 4.000000e+00 : f32
    %10 = vector.broadcast %cst_4 : f32 to vector<1x1x256xf32>
    %11 = arith.divf %9, %10 : vector<1x1x256xf32>
    %cst_5 = arith.constant 9.99999997E-7 : f32
    %12 = vector.broadcast %cst_5 : f32 to vector<1x1x256xf32>
    %13 = arith.addf %11, %12 : vector<1x1x256xf32>
    %14 = math.rsqrt %13 : vector<1x1x256xf32>
    %15 = vector.broadcast %14 : vector<1x1x256xf32> to vector<1x4x256xf32>
    %16 = arith.mulf %6, %15 : vector<1x4x256xf32>
    %c0_6 = arith.constant 0 : index
    %c0_7 = arith.constant 0 : index
    %c0_8 = arith.constant 0 : index
    %17 = vector.load %arg3[%c0_6, %c0_7, %c0_8] : memref<1x4x256xf32, #tpu.memory_space<vmem>>, vector<1x4x256xf32>
    %18 = arith.mulf %17, %16 : vector<1x4x256xf32>
    %c0_9 = arith.constant 0 : index
    %c0_10 = arith.constant 0 : index
    %c0_11 = arith.constant 0 : index
    %19 = vector.load %arg4[%c0_9, %c0_10, %c0_11] : memref<1x4x256xf32, #tpu.memory_space<vmem>>, vector<1x4x256xf32>
    %20 = arith.addf %18, %19 : vector<1x4x256xf32>
    %c0_12 = arith.constant 0 : index
    %c0_13 = arith.constant 0 : index
    %c0_14 = arith.constant 0 : index
    %21 = vector.load %arg5[%c0_12, %c0_13, %c0_14] : memref<1x4x256xf32, #tpu.memory_space<vmem>>, vector<1x4x256xf32>
    tpu.vector_store %arg5[%c0_12, %c0_13, %c0_14], %20 {strides = array<i32>} : memref<1x4x256xf32, #tpu.memory_space<vmem>>, vector<1x4x256xf32>,
    return
  }
  func.func @transform_0(%arg0: i32, %arg1: i32) -> (i32, i32, i32) {
    %c0_i32 = arith.constant 0 : i32
    %c0_i32_0 = arith.constant 0 : i32
    return %arg0, %c0_i32, %arg1 : i32, i32, i32
  }
  func.func @transform_1(%arg0: i32, %arg1: i32) -> (i32, i32, i32) {
    %c0_i32 = arith.constant 0 : i32
    %c0_i32_0 = arith.constant 0 : i32
    %c0_i32_1 = arith.constant 0 : i32
    %c0_i32_2 = arith.constant 0 : i32
    return %c0_i32, %c0_i32_0, %c0_i32_1 : i32, i32, i32
  }
  func.func @transform_2(%arg0: i32, %arg1: i32) -> (i32, i32, i32) {
    %c0_i32 = arith.constant 0 : i32
    %c0_i32_0 = arith.constant 0 : i32
    %c0_i32_1 = arith.constant 0 : i32
    %c0_i32_2 = arith.constant 0 : i32
    return %c0_i32, %c0_i32_0, %c0_i32_1 : i32, i32, i32
  }
  func.func @transform_3(%arg0: i32, %arg1: i32) -> (i32, i32, i32) {
    %c0_i32 = arith.constant 0 : i32
    %c0_i32_0 = arith.constant 0 : i32
    return %arg0, %c0_i32, %arg1 : i32, i32, i32
  }
}

</mosaic_0001>

<bundles_post_ra>
// kernel: tpu_custom_call.1
= control target key start
LH: loop header
LB: loop body
LE: loop exit
PB: predicated region body
PF: predicated region fallthrough
CT: control target
= control target key end

     0   :  { %8 = vsyncpa [#allocation3], 0  ;;  %s917_s0 = inlined_call_operand.hbm [shape: f32[2,4,256], index: 0, kind: input, shape index: {}]   ;;  %s918_s1 = inlined_call_operand.hbm [shape: f32[1,4,256], index: 1, kind: input, shape index: {}]   ;;  %s919_s2 = inlined_call_operand.hbm [shape: f32[1,4,256], index: 2, kind: input, shape index: {}]   ;;  %s920_s3 = inlined_call_operand.hbm [shape: f32[2,4,256], index: 3, kind: output, shape index: {}]  }
   0x1   :  { %10 = vsyncpa [#allocation3 + $0x1], 0 }
   0x2   :  { %11 = vsyncpa [#allocation6], 0 }
   0x3   :  { %12 = vsyncpa [#allocation4], 0 }
   0x4   :  { %14 = vsyncpa [#allocation4 + $0x1], 0  ;;  %s765_s12 = smov 0   ;;  %s767_s13 = smov 0  }
   0x5   :  { %s769_s14 = smov 0   ;;  %s771_s15 = smov 0  }
   0x6   :  { %s773_s16 = smov 0   ;;  %s775_s17 = smov 0  }
   0x7 LB: > { %s453_s18 = sadd.s32 4294967295, %s740_s17   ;;  %s454_s19 = sadd.s32 4294967294, %s740_s17   ;;  %s740_s17 = sphi %s775_s17, %s20_s17   ;;  %s736_s16 = sphi %s773_s16, %s930_s16   ;;  %s732_s15 = sphi %s771_s15, %s929_s15   ;;  %s728_s14 = sphi %s769_s14, %s928_s14   ;;  %s724_s13 = sphi %s767_s13, %s927_s13   ;;  %s720_s12 = sphi %s765_s12, %s926_s12  }
   0x8   : > { %p54_p0 = scmp.ne.s32.totalorder %s724_s13, %s720_s12  ;;  %p799_p1 = scmp.eq.s32.totalorder %s453_s18, 0 }
   0x9   : > { %p128_p2 = scmp.eq.s32.totalorder %s454_s19, 1  ;;  %p455_p4 = scmp.ge.s32.totalorder %s740_s17, 1 }
   0xa   : > { %p805_p3 = por %p799_p1, %p54_p0  ;;  %p135_p6 = scmp.lt.s32.totalorder %s740_s17, 3 }
   0xb   : > { %p810_p5 = por %p128_p2, %p54_p0  ;;  %s147_s25 = sshll.u32 %s918_s1, 4  ;;  %s148_s25 = int_to_ptr.hbm [resolvable:$true] %s147_s25 }
   0xc   : > { %p818_p7 = pnand %p455_p4, %p135_p6  ;;  %p458_p8 = scmp.ge.s32.totalorder %s740_s17, 2 }
   0xd   : > { %s742_s27 = smov [#allocation5]   ;;  %s159_s4 = sshll.u32 %s919_s2, 4  ;;  %s160_s4 = int_to_ptr.hbm [resolvable:$true] %s159_s4 }
   0xe   : > { %p486_p9 = pneg %p818_p7  ;;  %s149_s28 = sshll.u32 %s742_s27, 4  ;;  %s150_s28 = int_to_ptr.vmem [resolvable:$true] %s149_s28 }
   0xf   : > { %s743_s5 = smov [#allocation7]   ;;  %p122_p11 = scmp.eq.s32.totalorder %s453_s18, 1 }
  0x10   : > { %p487_p10 = pnand %p486_p9, %p799_p1  ;;  %s161_s6 = sshll.u32 %s743_s5, 4  ;;  %s162_s6 = int_to_ptr.vmem [resolvable:$true] %s161_s6 }
  0x11   : > { %s32_s7 = sadd.s32 1, %s736_s16  ;;  %s41_s8 = sadd.s32 1, %s728_s14 }
  0x12   : > { %489 = dma.hbm_to_vmem [thread:$0]  (!%p487_p10), %s148_s25, 128, %s150_s28, [#allocation6]  }
  0x13   : > { %492 = dma.hbm_to_vmem [thread:$0]  (!%p487_p10), %s160_s4, 128, %s162_s6, [#allocation6]  }
  0x14   : > { %p34_p12 = scmp.ge.s32.totalorder %s32_s7, 2  ;;  %p48_p13 = scmp.ne.s32.totalorder %s728_s14, %s724_s13 }
  0x15   : > { %p49_p0 = scmp.eq.s32.totalorder %s740_s17, 0  ;;  %p503_p4 = scmp.lt.s32.totalorder %s740_s17, 2 }
  0x16   : > { %s932_s7 = smov (%p34_p12, %s32_s7), 0  ;;  %p837_p2 = por %p122_p11, %p48_p13 }
  0x17   : > { %s36_s10 = ssub.s32 %s736_s16, %s932_s7  ;;  %s172_s11 = sand.u32 1, %s728_s14  }
  0x18   : > { %p39_p6 = scmp.eq.s32.totalorder %s36_s10, 0  ;;  %p50_p9 = por %p49_p0, %p48_p13 }
  0x19   : > { %s459_s19 = sshll.u32 %s172_s11, 3  ;;  %s472_s18 = sshll.u32 %s736_s16, 3 }
  0x1a   : > { %s847_s23 = scalar_select %p39_p6, %s728_s14, %s41_s8  }
  0x1b   : > { %s183_s27 = scalar_lea.hbm %s917_s0, %s472_s18  ;;  %s176_s29 = scalar_lea.vmem [#allocation2], %s459_s19 }
  0x1c   : > { %s185_s28 = sshll.u32 %s183_s27, 4  ;;  %s187_s30 = sshll.u32 %s176_s29, 4  ;;  %s186_s28 = int_to_ptr.hbm [resolvable:$true] %s185_s28  ;;  %s188_s30 = int_to_ptr.vmem [resolvable:$true] %s187_s30 }
  0x1d   : > { %p494_p10 = pnand %p503_p4, %p50_p9  ;;  %s173_s4 = scalar_lea.sflag [#allocation3], %s172_s11 }
  0x1e   : > { %196 = sbr.rel (%p818_p7) target bundleno = 126 (0x7e), region = 32  ;;  %s857_s5 = sand.u32 (!%p818_p7), 1, %s724_s13  }
  0x1f   : > { %496 = dma.hbm_to_vmem [thread:$0]  (!%p494_p10), %s186_s28, 128, %s188_s30, %s173_s4  }
  0x20   : > { %s463_s6 = sshll.u32 (!%p818_p7), %s857_s5, 3  ;;  %s199_s8 = scalar_lea.sflag (!%p818_p7), [#allocation3], %s857_s5 }
  0x21   : > { %s202_s10 = scalar_lea.vmem (!%p818_p7), [#allocation2], %s463_s6 }
  0x23   : > { %707 = dma.done.wait (%p805_p3), %s199_s8, 128  }
  0x24   : > { %709 = vsyncadd (%p805_p3), %s199_s8, 4294967168 }
  0x25   : > { %711 = dma.done.wait (%p799_p1), [#allocation6], 256  }
  0x26   : > { %713 = vsyncadd (%p799_p1), [#allocation6], 4294967040  ;;  %v744_v0 = vmov 4.0   ;;  %v238_v2 = vld [vmem:[%s202_s10] sm:$0xff]  ;;  %vm245_vm0 = vcmask 1043456   ;;  %s473_s20 = sshll.u32 %s732_s15, 3 }
  0x27   : > { %558 = vrcp.f32 %v744_v0  ;;  %240 = vst [vmem:[#allocation1] ss:$2 sm:$0xff] %v238_v2  ;;  %s345_s11 = scalar_lea.hbm %s920_s3, %s473_s20  ;;  %s235_s19 = scalar_lea.vmem [#allocation8], %s463_s6 }
  0x28   : > { %s347_s18 = sshll.u32 %s235_s19, 4  ;;  %s349_s15 = sshll.u32 %s345_s11, 4  ;;  %s348_s18 = int_to_ptr.vmem [resolvable:$true] %s347_s18  ;;  %s350_s15 = int_to_ptr.hbm [resolvable:$true] %s349_s15 }
  0x29   : > { %s332_s24 = scalar_lea.sflag [#allocation4], %s857_s5  ;;  %s668_s25 = sshra.s32 %s350_s15, 4  ;;  %s669_s25 = int_to_ptr.hbm [resolvable:$true] %s668_s25 }
  0x2a   : > { %s670_s27 = scalar_lea.hbm %s669_s25, 8  ;;  %s674_s30 = scalar_lea.hbm %s920_s3, 16 }
  0x2b   : > { %p671_p1 = scmp.ne.s32.totalorder %s669_s25, %s670_s27  ;;  %p675_p11 = scmp.lt.s32.totalorder %s669_s25, %s920_s3 }
  0x2c   : > { %p676_p12 = scmp.lt.s32.totalorder %s674_s30, %s670_s27 }
  0x2d   : > { %v559_v1 = vpop.eup %558  ;;  %p672_p3 = pnand %p671_p1, %p837_p2 }
  0x2e   : > { %v261_v3 = vmul.f32 4.0, %v559_v1  ;;  %v241_v5 = vld.sshfl [vmem:[#allocation1] sm:$0xff pattern:$0x75316420]  ;;  %vm265_vm1 = vweird.f32 %v559_v1  ;;  %p677_p13 = por %p676_p12, %p675_p11 }
  0x2f   : > { %v242_v6 = vld.sshfl [vmem:[#allocation1 + $0x8] sm:$0xff pattern:$0x75316420]  ;;  %v246_v7 = vsel %vm245_vm0, %v241_v5, 0.0  ;;  %p673_p7 = pneg %p672_p3 }
  0x30   : > { %v262_v4 = vsub.f32 1.0, %v261_v3  ;;  %v253_v8 = vsel %vm245_vm0, %v242_v6, 0.0  ;;  %v247_v9 = vrot.slane %v246_v7, 4 }
  0x31   : > { %v254_v10 = vrot.slane %v253_v8, 4  ;;  %p678_p0 = pnand %p677_p13, %p673_p7 }
  0x32   : > { %v263_v11 = vmul.f32 %v559_v1, %v262_v4  ;;  %v248_v12 = vadd.f32 %v247_v9, %v246_v7  ;;  %v328_v4 = vld [vmem:[#allocation7] sm:$0xff] }
  0x33   : > { %v255_v13 = vadd.f32 %v254_v10, %v253_v8 }
  0x34   : > { %v249_v14 = vrot.slane %v248_v12, 2  ;;  %v264_v16 = vadd.f32 %v559_v1, %v263_v11 }
  0x35   : > { %v256_v15 = vrot.slane %v255_v13, 2 }
  0x36   : > { %v250_v17 = vadd.f32 %v249_v14, %v248_v12  ;;  %v266_v21 = vsel %vm265_vm1, %v559_v1, %v264_v16 }
  0x37   : > { %v257_v18 = vadd.f32 %v256_v15, %v255_v13 }
  0x38   : > { %v251_v19 = vrot.slane %v250_v17, 1 }
  0x39   : > { %v258_v20 = vrot.slane %v257_v18, 1 }
  0x3a   : > { %v252_v22 = vadd.f32 %v251_v19, %v250_v17 }
  0x3b   : > { %v259_v23 = vadd.f32 %v258_v20, %v257_v18 }
  0x3c   : > { %v267_v25 = vmul.f32 %v266_v21, %v252_v22 }
  0x3d   : > { %v268_v24 = vmul.f32 %v266_v21, %v259_v23 }
  0x3f   : > { %v271_v26 = vrot.slane %v268_v24, 4 }
  0x41   : > { %v272_v27 = vsel %vm245_vm0, %v267_v25, %v271_v26 }
  0x42   : > { %v274_v28 = vsub.f32 %v238_v2, %v272_v27  ;;  %v326_v2 = vld [vmem:[#allocation5] sm:$0xff] }
  0x44   : > { %v275_v29 = vmul.f32 %v274_v28, %v274_v28 }
  0x46   : > { %277 = vst [vmem:[#allocation1] ss:$2 sm:$0xff] %v275_v29 }
  0x4d   : > { %v278_v30 = vld.sshfl [vmem:[#allocation1] sm:$0xff pattern:$0x75316420]  ;;  %v279_v31 = vld.sshfl [vmem:[#allocation1 + $0x8] sm:$0xff pattern:$0x75316420] }
  0x4e   : > { %v282_v32 = vsel %vm245_vm0, %v278_v30, 0.0  ;;  %v289_v33 = vsel %vm245_vm0, %v279_v31, 0.0 }
  0x4f   : > { %v283_v34 = vrot.slane %v282_v32, 4  ;;  %v290_v35 = vrot.slane %v289_v33, 4 }
  0x51   : > { %v284_v36 = vadd.f32 %v283_v34, %v282_v32  ;;  %v291_v37 = vadd.f32 %v290_v35, %v289_v33 }
  0x53   : > { %v285_v38 = vrot.slane %v284_v36, 2  ;;  %v292_v39 = vrot.slane %v291_v37, 2 }
  0x55   : > { %v286_v40 = vadd.f32 %v285_v38, %v284_v36  ;;  %v293_v41 = vadd.f32 %v292_v39, %v291_v37 }
  0x57   : > { %v287_v42 = vrot.slane %v286_v40, 1  ;;  %v294_v43 = vrot.slane %v293_v41, 1 }
  0x59   : > { %v288_v44 = vadd.f32 %v287_v42, %v286_v40  ;;  %v295_v45 = vadd.f32 %v294_v43, %v293_v41 }
  0x5b   : > { %v296_v46 = vmul.f32 %v288_v44, %v266_v21  ;;  %v297_v47 = vmul.f32 %v295_v45, %v266_v21 }
  0x5d   : > { %v298_v48 = vadd.f32 1e-06, %v296_v46  ;;  %v299_v49 = vadd.f32 1e-06, %v297_v47 }
  0x5f   : > { %560 = vrsqrt.f32 %v298_v48  ;;  %vm316_vm4 = vweird.f32 %v299_v49  ;;  %vm306_vm6 = vweird.f32 %v298_v48 }
  0x60   : > { %562 = vrsqrt.f32 %v299_v49 }
  0x65   : > { %v561_v50 = vpop.eup %560 }
  0x66   : > { %v563_v51 = vpop.eup %562  ;;  %v301_v52 = vmul.f32 %v561_v50, %v298_v48  ;;  %vm307_vm3 = vweird.f32 %v561_v50 }
  0x67   : > { %v311_v53 = vmul.f32 %v563_v51, %v299_v49  ;;  %vm317_vm2 = vweird.f32 %v563_v51  ;;  %vm308_vm7 = vmor %vm306_vm6, %vm307_vm3 }
  0x68   : > { %v302_v54 = vmul.f32 %v561_v50, %v301_v52  ;;  %vm318_vm5 = vmor %vm316_vm4, %vm317_vm2 }
  0x69   : > { %v312_v55 = vmul.f32 %v563_v51, %v311_v53 }
  0x6a   : > { %v303_v56 = vmul.f32 0.5, %v302_v54 }
  0x6b   : > { %v313_v57 = vmul.f32 0.5, %v312_v55 }
  0x6c   : > { %v304_v58 = vsub.f32 1.5, %v303_v56 }
  0x6d   : > { %v314_v59 = vsub.f32 1.5, %v313_v57 }
  0x6e   : > { %v305_v60 = vmul.f32 %v561_v50, %v304_v58 }
  0x6f   : > { %v315_v61 = vmul.f32 %v563_v51, %v314_v59 }
  0x70   : > { %v309_v0 = vsel %vm308_vm7, %v561_v50, %v305_v60 }
  0x71   : > { %v319_v62 = vsel %vm318_vm5, %v563_v51, %v315_v61 }
  0x72   : > { %v322_v63 = vrot.slane %v319_v62, 4 }
  0x74   : > { %v323_v1 = vsel %vm245_vm0, %v309_v0, %v322_v63 }
  0x75   : > { %v325_v3 = vmul.f32 %v323_v1, %v274_v28 }
  0x77   : > { %v327_v5 = vmul.f32 %v326_v2, %v325_v3 }
  0x79   : > { %v329_v6 = vadd.f32 %v328_v4, %v327_v5 }
  0x7b   : > { %330 = vst [vmem:[%s235_s19] sm:$0xff] %v329_v6 }
  0x7c   : > { %681 = shalt.err (!%p678_p0)
}
  0x7d   : > { %484 = dma.vmem_to_hbm [thread:$0]  (%p837_p2), %s348_s18, 128, %s350_s15, %s332_s24  }
  0x7e PF: > { %s361_s5 = sand.u32 1, %s720_s12   ;;  %p498_p4 = pnand %p458_p8, %p810_p5 }
  0x7f   : > { %s362_s8 = scalar_lea.sflag [#allocation4], %s361_s5 }
  0x80   : > { %p499_p6 = pneg %p498_p4 }
  0x82   : > { %715 = dma.done.wait (%p499_p6), %s362_s8, 128  }
  0x83   : > { %717 = vsyncadd (%p499_p6), %s362_s8, 4294967168  ;;  %s20_s17 = sadd.s32 1, %s740_s17   ;;  %s926_s12 = smov %s724_s13 }
  0x84   : > { %p17_p9 = scmp.ge.s32.totalorder %s20_s17, 4   ;;  %s927_s13 = smov %s728_s14 }
  0x85   : > { %s928_s14 = smov %s847_s23  ;;  %s929_s15 = smov %s736_s16 }
  0x86   : > { %s930_s16 = smov %s932_s7  ;;  %19 = sbr.rel (!%p17_p9) target bundleno = 7 (0x7), region = 85 }
  0x8b   :  { %368 = vsyncpa [#allocation3], 1 }
  0x8c   :  { %370 = vsyncpa [#allocation3 + $0x1], 1 }
  0x8d   :  { %371 = vsyncpa [#allocation6], 1 }
  0x8e   :  { %372 = vsyncpa [#allocation4], 1 }
  0x8f   :  { %374 = vsyncpa [#allocation4 + $0x1], 1 }

</bundles_post_ra>
